<compile_context>
chip_gen: v7x
topology: tpu7x:2x2x1
jax: 0.10.0
libtpu: 0.0.40
codegen_flags: <defaults>
</compile_context>

<pallas_src>
import jax
import jax.numpy as jnp
from jax.experimental import pallas as pl
from jax.experimental.pallas import tpu as pltpu


def _scale_kernel(x_ref, o_ref):
    x = x_ref[...]
    # softmax over the size-1 score axis == 1.0 exactly  ->  weight = tanh(1),
    # computed in the input dtype (constant-folded by the compiler).
    w = jnp.tanh(jnp.ones((), dtype=x.dtype))
    o_ref[...] = x * w


def _round_up(a, b):
    return -(-a // b) * b


def _pick_tile_rows(rows, cols, itemsize):
    """Row-tile size: as large as the VMEM budget allows, but keep several grid
    steps on large inputs (v7x megacore sharding + DMA/compute overlap)."""
    budget = 40 * 1024 * 1024                               # under 48 MiB limit
    row_bytes = cols * itemsize
    cap = max(8, (budget // (4 * row_bytes)) // 8 * 8)      # 2 in + 2 out bufs
    want = _round_up(max(pl.cdiv(rows, 8), 8), 8)           # aim for ~8 steps
    return int(min(cap, want))


def temp_attention(x, q=None):
    """Forward of Temp_Attention.

    `q` (the (D, 1) parameter) is accepted for API parity with the PyTorch
    module but does not affect the value: softmax over the size-1 score axis is
    exactly 1, so out = x * tanh(1).  Output has the same shape and dtype as x.
    """
    del q  # mathematically irrelevant to the forward value (see header comment)
    if x.size == 0:
        return x

    orig_shape = x.shape
    d = orig_shape[-1]
    n = x.size

    if n % 128 == 0:
        rows, cols = n // 128, 128       # lane-dense: unmasked 128-wide stores
    else:
        rows, cols = n // d, d           # fall back to (M, D) row view

    x2 = x.reshape(rows, cols)           # contiguous reshape: no data movement
    tm = _pick_tile_rows(rows, cols, x.dtype.itemsize)

    out = pl.pallas_call(
        _scale_kernel,
        out_shape=jax.ShapeDtypeStruct((rows, cols), x.dtype),
        grid=(pl.cdiv(rows, tm),),
        in_specs=[pl.BlockSpec((tm, cols), lambda i: (i, 0))],
        out_specs=pl.BlockSpec((tm, cols), lambda i: (i, 0)),
        compiler_params=pltpu.CompilerParams(
            dimension_semantics=("parallel",),
            vmem_limit_bytes=48 * 1024 * 1024,
        ),
    )(x2)
    return out.reshape(orig_shape)


if __name__ == "__main__":
    key = jax.random.PRNGKey(0)
    x_key, q_key, x2_key = jax.random.split(key, 3)

    def reference(x, q):
        # Literal pure-JAX transcription of the PyTorch forward.
        s = x @ q
        s = s * jax.nn.sigmoid(s)                  # SiLU
        w = jax.nn.softmax(s, axis=-1)             # size-1 axis -> exactly 1.0
        w = jnp.tanh(w)
        return x * w

    # Main case: (batch, seq, hidden) = (2, 8, 32)  -> lane-dense path.
    B, S, D = 2, 8, 32
    x = jax.random.normal(x_key, (B, S, D), dtype=jnp.float32)
    q = jax.random.uniform(q_key, (D, 1), dtype=jnp.float32)   # torch.rand(D, 1)

    out = jax.block_until_ready(temp_attention(x, q))
    ref = reference(x, q)
    assert out.shape == x.shape, out.shape
    assert out.dtype == x.dtype, out.dtype
    assert bool(jnp.all(jnp.isfinite(out)))
    assert bool(jnp.allclose(out, ref, atol=1e-6, rtol=1e-6))

    # Odd shape: element count not a multiple of 128 -> (M, D) fallback path
    # with a partial trailing row block (no wrapper pad/slice copies).
    x_odd = jax.random.normal(x2_key, (3, 5, D), dtype=jnp.float32)
    out_odd = jax.block_until_ready(temp_attention(x_odd, q))
    assert bool(jnp.allclose(out_odd, reference(x_odd, q), atol=1e-6, rtol=1e-6))

    print("KERNEL_OK")
</pallas_src>

<mosaic_0001>
module attributes {stable_mosaic.version = 11 : i64} {
  func.func @_scale_kernel(%arg0: i32, %arg1: memref<8x128xf32, #tpu.memory_space<vmem>>, %arg2: memref<8x128xf32, #tpu.memory_space<vmem>>) attributes {dimension_semantics = [#tpu.dimension_semantics<parallel>], iteration_bounds = array<i64: 1>, scalar_prefetch = 0 : i64, scratch_operands = 0 : i64, tpu.core_type = #tpu.core_type<tc>, window_params = [{transform_indices = @transform_0, window_bounds = array<i64: 8, 128>}, {transform_indices = @transform_1, window_bounds = array<i64: 8, 128>}]} {
    %c0 = arith.constant 0 : index
    %c0_0 = arith.constant 0 : index
    %0 = vector.load %arg1[%c0, %c0_0] : memref<8x128xf32, #tpu.memory_space<vmem>>, vector<8x128xf32>
    %cst = arith.constant 1.000000e+00 : f32
    %1 = math.tanh %cst : f32
    %2 = vector.broadcast %1 : f32 to vector<8x128xf32>
    %3 = arith.mulf %0, %2 : vector<8x128xf32>
    %c0_1 = arith.constant 0 : index
    %c0_2 = arith.constant 0 : index
    %4 = vector.load %arg2[%c0_1, %c0_2] : memref<8x128xf32, #tpu.memory_space<vmem>>, vector<8x128xf32>
    tpu.vector_store %arg2[%c0_1, %c0_2], %3 {strides = array<i32>} : memref<8x128xf32, #tpu.memory_space<vmem>>, vector<8x128xf32>,
    return
  }
  func.func @transform_0(%arg0: i32) -> (i32, i32) {
    %c0_i32 = arith.constant 0 : i32
    %c0_i32_0 = arith.constant 0 : i32
    return %arg0, %c0_i32 : i32, i32
  }
  func.func @transform_1(%arg0: i32) -> (i32, i32) {
    %c0_i32 = arith.constant 0 : i32
    %c0_i32_0 = arith.constant 0 : i32
    return %arg0, %c0_i32 : i32, i32
  }
}

</mosaic_0001>

<bundles_post_ra>
// kernel: tpu_custom_call.1
= control target key start
LH: loop header
LB: loop body
LE: loop exit
PB: predicated region body
PF: predicated region fallthrough
CT: control target
= control target key end

     0   :  { %6 = vsyncpa [#allocation3], 0  ;;  %s133_s0 = inlined_call_operand.hbm [shape: f32[4,128], index: 0, kind: input, shape index: {}]   ;;  %s134_s1 = inlined_call_operand.hbm [shape: f32[4,128], index: 1, kind: output, shape index: {}]  }
   0x1   :  { %7 = vsyncpa [#allocation4], 0 }
   0x2   :  { %12 = vsyncadd [#allocation3], 64  ;;  %s95_s6 = smov [#allocation2]   ;;  %s47_s10 = scalar_lea.hbm %s133_s0, 64 }
   0x3   :  { %s13_s7 = sshll.u32 %s95_s6, 4  ;;  %p48_p0 = scmp.ne.s32.totalorder %s133_s0, %s47_s10  ;;  %s14_s7 = int_to_ptr.vmem [resolvable:$true] %s13_s7 }
   0x4   :  { %p51_p1 = scmp.lt.u32.totalorder %s47_s10, %s133_s0 }
   0x6   :  { %p53_p2 = pnand %p51_p1, %p48_p0 }
   0x8   :  { %56 = shalt.err (!%p53_p2)
}
   0x9   :  { %s57_s15 = scalar_lea.vmem %s14_s7, 64  ;;  %s61_s16 = scalar_lea.vmem %s14_s7, 128 }
   0xa   :  { %p58_p3 = scmp.ne.s32.totalorder %s14_s7, %s57_s15  ;;  %p62_p4 = scmp.lt.s32.totalorder %s14_s7, %s14_s7 }
   0xb   :  { %p63_p5 = scmp.lt.s32.totalorder %s61_s16, %s57_s15 }
   0xd   :  { %p64_p6 = por %p63_p5, %p62_p4 }
   0xf   :  { %p65_p7 = pnand %p64_p6, %p58_p3 }
  0x11   :  { %68 = shalt.err (!%p65_p7)
}
  0x12   :  { %s96_s17 = smov 64   ;;  %s97_s18 = smov 4  }
  0x13   :  { %19 = dma.hbm_to_vmem [thread:$0]  %s133_s0, 64, %s14_s7, [#allocation3], %s96_s17, %s96_s17, %s97_s18  }
  0x14   :  { %91 = dma.done.wait [#allocation3], 128  }
  0x15   :  { %92 = vsyncadd [#allocation3], 4294967168  ;;  %v23_v0 = vld [vmem:[#allocation2] sm:$0xff] }
  0x16   :  { %v24_v1 = vmul.f32 0.7615942, %v23_v0 }
  0x18   :  { %25 = vst [vmem:[#allocation5] sm:$0xff] %v24_v1 }
  0x19   :  { %30 = vsyncadd [#allocation4], 64  ;;  %s98_s21 = smov [#allocation5]  }
  0x1a   :  { %s31_s22 = sshll.u32 %s98_s21, 4  ;;  %s32_s22 = int_to_ptr.vmem [resolvable:$true] %s31_s22 }
  0x1b   :  { %s69_s23 = scalar_lea.vmem %s32_s22, 64  ;;  %s73_s24 = scalar_lea.vmem %s32_s22, 128 }
  0x1c   :  { %p70_p8 = scmp.ne.s32.totalorder %s32_s22, %s69_s23  ;;  %p74_p9 = scmp.lt.s32.totalorder %s32_s22, %s32_s22 }
  0x1d   :  { %p75_p10 = scmp.lt.s32.totalorder %s73_s24, %s69_s23 }
  0x1f   :  { %p76_p11 = por %p75_p10, %p74_p9 }
  0x21   :  { %p77_p12 = pnand %p76_p11, %p70_p8 }
  0x23   :  { %80 = shalt.err (!%p77_p12)
}
  0x24   :  { %s81_s0 = scalar_lea.hbm %s134_s1, 64 }
  0x25   :  { %p82_p13 = scmp.ne.s32.totalorder %s134_s1, %s81_s0  ;;  %p85_p0 = scmp.lt.u32.totalorder %s81_s0, %s134_s1 }
  0x27   :  { %p87_p1 = pnand %p85_p0, %p82_p13 }
  0x29   :  { %90 = shalt.err (!%p87_p1)
}
  0x2a   :  { %37 = dma.vmem_to_hbm [thread:$0]  %s32_s22, 64, %s134_s1, [#allocation4], %s96_s17, %s96_s17, %s97_s18  }
  0x2b   :  { %93 = dma.done.wait [#allocation4], 128  }
  0x2c   :  { %94 = vsyncadd [#allocation4], 4294967168 }
  0x2d   :  { %41 = vsyncpa [#allocation3], 1 }
  0x2e   :  { %42 = vsyncpa [#allocation4], 1 }

</bundles_post_ra>
